<compile_context>
chip_gen: v7x
topology: tpu7x:2x2x1
jax: 0.10.0
libtpu: 0.0.40
codegen_flags: <defaults>
</compile_context>

<pallas_src>
import jax
import jax.numpy as jnp
from jax.experimental import pallas as pl
from jax.experimental.pallas import tpu as pltpu


def _centroid_pool_kernel(latent_ref, coords_ref, c2_ref, idx_ref):
    x = latent_ref[...]      # (TB, D) f32   streamed batch tile
    c = coords_ref[...]      # (K, D)  f32   resident (constant index map)
    c2 = c2_ref[...]         # (K, 1)  f32   precomputed ||c_k||^2

    # score[k, t] = ||c_k||^2 - 2 * c_k . x_t
    # argmin_k score[k, t] == argmin_k ||x_t - c_k||^2  (||x_t||^2 is a
    # per-column constant and does not affect the winner).
    dots = jax.lax.dot_general(
        c, x,
        dimension_numbers=(((1,), (1,)), ((), ())),   # contract D -> (K, TB)
        preferred_element_type=jnp.float32)            # MXU
    score = c2 - 2.0 * dots                            # (K, TB)

    n_clusts = score.shape[0]
    min_s = jnp.min(score, axis=0, keepdims=True)      # (1, TB) sublane reduce
    k_iota = jax.lax.broadcasted_iota(jnp.int32, score.shape, 0)
    idx = jnp.min(jnp.where(score == min_s, k_iota, n_clusts),
                  axis=0, keepdims=True)               # first match on ties
    idx_ref[...] = idx.astype(jnp.int32)               # lane-dense (1, TB) store

    # TODO(synk): cluster_distances (||latent - coords[idx]||) is computed in
    # the reference module but never used/returned, so it is omitted here.


def centroid_pool_forward(latent, coords, *, block_b=512):
    """latent: (B, D) float, coords: (K, D) float -> (B,) int32 indices."""
    latent = latent.astype(jnp.float32)
    coords = coords.astype(jnp.float32)
    B, D = latent.shape
    K, _ = coords.shape

    # Batch tile: multiple of 128 (lane-dense output blocks) when tiling,
    # otherwise the whole (small) batch in a single block.
    tb = block_b if B > block_b else B
    b_pad = pl.cdiv(B, tb) * tb
    if b_pad != B:
        latent = jnp.pad(latent, ((0, b_pad - B), (0, 0)))

    # Hoisted centroid squared norms (coords is a parameter; tiny).
    c2 = jnp.sum(coords * coords, axis=1, keepdims=True)   # (K, 1)

    out = pl.pallas_call(
        _centroid_pool_kernel,
        out_shape=jax.ShapeDtypeStruct((1, b_pad), jnp.int32),
        grid=(b_pad // tb,),
        in_specs=[
            pl.BlockSpec((tb, D), lambda i: (i, 0)),    # latent tile (streamed)
            pl.BlockSpec((K, D), lambda i: (0, 0)),     # coords (resident)
            pl.BlockSpec((K, 1), lambda i: (0, 0)),     # ||c||^2 (resident)
        ],
        out_specs=pl.BlockSpec((1, tb), lambda i: (0, i)),  # lane-dense indices
        compiler_params=pltpu.CompilerParams(
            dimension_semantics=("parallel",),
            vmem_limit_bytes=32 * 1024 * 1024,
        ),
    )(latent, coords, c2)
    return out[0, :B]


def _reference(latent, coords):
    d = jnp.linalg.norm(latent[:, None, :] - coords[None, :, :], axis=-1)
    return jnp.argmin(d, axis=1).astype(jnp.int32)


if __name__ == "__main__":
    key = jax.random.PRNGKey(0)
    k_lat, k_coords, k_big = jax.random.split(key, 3)

    n_clusts, n_dims, batch = 16, 32, 8

    # Deterministic parameter init (mirrors torch.rand -> uniform [0, 1)).
    coords = jax.random.uniform(k_coords, (n_clusts, n_dims), dtype=jnp.float32)
    latent = jax.random.normal(k_lat, (batch, n_dims), dtype=jnp.float32)

    closest = centroid_pool_forward(latent, coords)
    jax.block_until_ready(closest)
    assert closest.shape == (batch,)
    assert closest.dtype == jnp.int32
    assert bool(jnp.all(closest == _reference(latent, coords)))

    # Exercise the tiled path (multiple batch tiles + padded remainder).
    big_b = 1030
    latent_big = jax.random.normal(k_big, (big_b, n_dims), dtype=jnp.float32)
    closest_big = centroid_pool_forward(latent_big, coords)
    jax.block_until_ready(closest_big)
    assert closest_big.shape == (big_b,)
    assert bool(jnp.all(closest_big == _reference(latent_big, coords)))

    print("KERNEL_OK")
</pallas_src>

<mosaic_0001>
module attributes {stable_mosaic.version = 11 : i64} {
  func.func @_centroid_pool_kernel(%arg0: i32, %arg1: memref<8x32xf32, #tpu.memory_space<vmem>>, %arg2: memref<16x32xf32, #tpu.memory_space<vmem>>, %arg3: memref<16x1xf32, #tpu.memory_space<vmem>>, %arg4: memref<1x8xi32, #tpu.memory_space<vmem>>) attributes {dimension_semantics = [#tpu.dimension_semantics<parallel>], iteration_bounds = array<i64: 1>, scalar_prefetch = 0 : i64, scratch_operands = 0 : i64, tpu.core_type = #tpu.core_type<tc>, window_params = [{transform_indices = @transform_0, window_bounds = array<i64: 8, 32>}, {pipeline_mode = #tpu.pipeline_mode<synchronous>, transform_indices = @transform_1, window_bounds = array<i64: 16, 32>}, {pipeline_mode = #tpu.pipeline_mode<synchronous>, transform_indices = @transform_2, window_bounds = array<i64: 16, 1>}, {transform_indices = @transform_3, window_bounds = array<i64: 1, 8>}]} {
    %c0 = arith.constant 0 : index
    %c0_0 = arith.constant 0 : index
    %0 = vector.load %arg1[%c0, %c0_0] : memref<8x32xf32, #tpu.memory_space<vmem>>, vector<8x32xf32>
    %c0_1 = arith.constant 0 : index
    %c0_2 = arith.constant 0 : index
    %1 = vector.load %arg2[%c0_1, %c0_2] : memref<16x32xf32, #tpu.memory_space<vmem>>, vector<16x32xf32>
    %c0_3 = arith.constant 0 : index
    %c0_4 = arith.constant 0 : index
    %2 = vector.load %arg3[%c0_3, %c0_4] : memref<16x1xf32, #tpu.memory_space<vmem>>, vector<16x1xf32>
    %cst = arith.constant dense<0.000000e+00> : vector<16x8xf32>
    %3 = tpu.matmul %1, %0, %cst {dimension_numbers = #tpu.dot_dimension_numbers<[1], [1], [0], [0], [0, 0, 1, 0], [], []>} : vector<16x32xf32>, vector<8x32xf32>, vector<16x8xf32> -> vector<16x8xf32>
    %cst_5 = arith.constant 2.000000e+00 : f32
    %4 = vector.broadcast %cst_5 : f32 to vector<16x8xf32>
    %5 = arith.mulf %4, %3 : vector<16x8xf32>
    %6 = vector.broadcast %2 : vector<16x1xf32> to vector<16x8xf32>
    %7 = arith.subf %6, %5 : vector<16x8xf32>
    %cst_6 = arith.constant dense<0x7F800000> : vector<8xf32>
    %8 = vector.multi_reduction <minimumf>, %7, %cst_6 [0] : vector<16x8xf32> to vector<8xf32>
    %9 = vector.shape_cast %8 : vector<8xf32> to vector<1x8xf32>
    %10 = tpu.iota {dimensions = array<i32: 0>} : vector<16x8xi32>
    %11 = vector.broadcast %9 : vector<1x8xf32> to vector<16x8xf32>
    %12 = arith.cmpf oeq, %7, %11 : vector<16x8xf32>
    %c16_i32 = arith.constant 16 : i32
    %13 = vector.broadcast %c16_i32 : i32 to vector<16x8xi32>
    %14 = arith.select %12, %10, %13 : vector<16x8xi1>, vector<16x8xi32>
    %cst_7 = arith.constant dense<2147483647> : vector<8xi32>
    %15 = vector.multi_reduction <minsi>, %14, %cst_7 [0] : vector<16x8xi32> to vector<8xi32>
    %16 = vector.shape_cast %15 : vector<8xi32> to vector<1x8xi32>
    %c0_8 = arith.constant 0 : index
    %c0_9 = arith.constant 0 : index
    %17 = vector.load %arg4[%c0_8, %c0_9] : memref<1x8xi32, #tpu.memory_space<vmem>>, vector<1x8xi32>
    tpu.vector_store %arg4[%c0_8, %c0_9], %16 {strides = array<i32>} : memref<1x8xi32, #tpu.memory_space<vmem>>, vector<1x8xi32>,
    return
  }
  func.func @transform_0(%arg0: i32) -> (i32, i32) {
    %c0_i32 = arith.constant 0 : i32
    %c0_i32_0 = arith.constant 0 : i32
    return %arg0, %c0_i32 : i32, i32
  }
  func.func @transform_1(%arg0: i32) -> (i32, i32) {
    %c0_i32 = arith.constant 0 : i32
    %c0_i32_0 = arith.constant 0 : i32
    %c0_i32_1 = arith.constant 0 : i32
    return %c0_i32, %c0_i32_0 : i32, i32
  }
  func.func @transform_2(%arg0: i32) -> (i32, i32) {
    %c0_i32 = arith.constant 0 : i32
    %c0_i32_0 = arith.constant 0 : i32
    %c0_i32_1 = arith.constant 0 : i32
    return %c0_i32, %c0_i32_0 : i32, i32
  }
  func.func @transform_3(%arg0: i32) -> (i32, i32) {
    %c0_i32 = arith.constant 0 : i32
    %c0_i32_0 = arith.constant 0 : i32
    return %c0_i32, %arg0 : i32, i32
  }
}

</mosaic_0001>

<bundles_post_ra>
// kernel: tpu_custom_call.1
= control target key start
LH: loop header
LB: loop body
LE: loop exit
PB: predicated region body
PF: predicated region fallthrough
CT: control target
= control target key end

     0   :  { %8 = vsyncpa [#allocation3], 0  ;;  %s304_s0 = inlined_call_operand.hbm [shape: f32[8,32], index: 0, kind: input, shape index: {}]   ;;  %s305_s1 = inlined_call_operand.vmem [shape: f32[16,32], index: 1, kind: input, shape index: {}]   ;;  %s306_s2 = inlined_call_operand.vmem [shape: f32[16,1], index: 2, kind: input, shape index: {}]   ;;  %s307_s3 = inlined_call_operand.hbm [shape: s32[1,8], index: 3, kind: output, shape index: {}]  }
   0x1   :  { %9 = vsyncpa [#allocation4], 0  ;;  %s241_s12 = smov [#allocation2]   ;;  %s193_s16 = scalar_lea.hbm %s304_s0, 128 }
   0x2   :  { %s16_s13 = sshll.u32 %s241_s12, 4  ;;  %p194_p0 = scmp.ne.s32.totalorder %s304_s0, %s193_s16  ;;  %s17_s13 = int_to_ptr.vmem [resolvable:$true] %s16_s13 }
   0x3   :  { %p197_p1 = scmp.lt.u32.totalorder %s193_s16, %s304_s0 }
   0x5   :  { %p199_p2 = pnand %p197_p1, %p194_p0 }
   0x7   :  { %202 = shalt.err (!%p199_p2)
}
   0x8   :  { %s203_s21 = scalar_lea.vmem %s17_s13, 128  ;;  %p208_p4 = scmp.lt.s32.totalorder %s17_s13, %s17_s13 }
   0x9   :  { %p204_p3 = scmp.ne.s32.totalorder %s17_s13, %s203_s21  ;;  %p209_p5 = scmp.lt.s32.totalorder %s203_s21, %s203_s21 }
   0xb   :  { %p210_p6 = por %p209_p5, %p208_p4 }
   0xd   :  { %p211_p7 = pnand %p210_p6, %p204_p3 }
   0xf   :  { %214 = shalt.err (!%p211_p7)
}
  0x10   :  { %19 = dma.hbm_to_vmem [thread:$0]  %s304_s0, 128, %s17_s13, [#allocation3]  }
  0x11   :  { %237 = dma.done.wait [#allocation3], 128  }
  0x12   :  { %238 = vsyncadd [#allocation3], 4294967168  ;;  %v242_v0 = vmov 0   ;;  %vm32_vm0 = vcmask 261120   ;;  %v27_v1 = vld [vmem:[#allocation2] sm:$0xff]  ;;  %v29_v4 = vld [vmem:[%s305_s1 + $0x8] sm:$0xff]  ;;  %v141_v18 = vlaneseq }
  0x13   :  { %192 = vset.pattern.permute.xlu0 %v242_v0  ;;  %v28_v2 = vld [vmem:[%s305_s1] sm:$0xff]  ;;  %184 = vmatprep.subr.msk.mxu0 %vm32_vm0, %v27_v1  ;;  %v31_v5 = vld [vmem:[%s306_s2 + $0x8] sm:$0xff]  ;;  %vm131_vm1 = vcmask 64512   ;;  %s243_s1 = smov [#allocation5]   ;;  %vm161_vm7 = vcmask 57344  }
  0x14   :  { %186 = vmatprep.mubr.msk.f32.mxu0 %vm32_vm0, %v28_v2  ;;  %v30_v3 = vld [vmem:[%s306_s2] sm:$0xff]  ;;  %185 = vmatpush3.xpose.msk.msra.mxu0 %vm32_vm0, %v27_v1  ;;  %v142_v21 = vshrl.u32 %v141_v18, 7  ;;  %s169_s2 = sshll.u32 %s243_s1, 4  ;;  %s170_s2 = int_to_ptr.vmem [resolvable:$true] %s169_s2 }
  0x15   :  { %121 = vperm.xlu0 %192, %v30_v3   ;;  %s215_s4 = scalar_lea.vmem %s170_s2, 16  ;;  %s219_s5 = scalar_lea.vmem %s170_s2, 32 }
  0x16   :  { %v143_v24 = vadd.s32 8, %v142_v21  ;;  %p216_p8 = scmp.ne.s32.totalorder %s170_s2, %s215_s4  ;;  %p220_p9 = scmp.lt.s32.totalorder %s170_s2, %s170_s2 }
  0x17   :  { %187 = vmatmul.mubr.msk.f32.vlgmr.msra.gmra.mrb[0].mxu0 %vm32_vm0, %v29_v4  ;;  %p221_p10 = scmp.lt.s32.totalorder %s219_s5, %s215_s4 }
  0x19   :  { %126 = vperm.xlu0 %192, %v31_v5   ;;  %p222_p11 = por %p221_p10, %p220_p9 }
  0x1b   :  { %p223_p12 = pnand %p222_p11, %p216_p8 }
  0x94   :  { %v122_v6 = vpop.permute.xlu0 %121 }
  0x98   :  { %v127_v10 = vpop.permute.xlu0 %126 }
  0xea   :  { %v188_v7 = vpop.f32.mrb[0].mxu0 }
  0xeb   :  { %v118_v8 = vmul.f32 2.0, %v188_v7  ;;  %v108_v9 = vpop.f32.mrb[1].mxu0 }
  0xec   :  { %v117_v11 = vmul.f32 2.0, %v108_v9 }
  0xed   :  { %v130_v12 = vsub.f32 %v127_v10, %v118_v8 }
  0xee   :  { %v129_v13 = vsub.f32 %v122_v6, %v117_v11 }
  0xef   :  { %v133_v14 = vsel %vm131_vm1, %v130_v12, inf }
  0xf0   :  { %v132_v15 = vsel %vm131_vm1, %v129_v13, inf }
  0xf1   :  { %v134_v16 = vmin.f32 %v132_v15, %v133_v14 }
  0xf3   :  { %v135_v17 = vrot.slane %v134_v16, 4 }
  0xf5   :  { %v136_v19 = vmin.f32 %v134_v16, %v135_v17 }
  0xf7   :  { %v137_v20 = vrot.slane %v136_v19, 2 }
  0xf9   :  { %v138_v22 = vmin.f32 %v136_v19, %v137_v20 }
  0xfb   :  { %v139_v23 = vrot.slane %v138_v22, 1 }
  0xfd   :  { %v140_v25 = vmin.f32 %v138_v22, %v139_v23 }
  0xff   :  { %vm144_vm2 = vcmp.eq.f32.partialorder %v129_v13, %v140_v25  ;;  %vm145_vm3 = vcmp.eq.f32.partialorder %v130_v12, %v140_v25 }
 0x100   :  { %v146_v26 = vsel %vm144_vm2, %v142_v21, 16  ;;  %v147_v27 = vsel %vm145_vm3, %v143_v24, 16 }
 0x101   :  { %v148_v28 = vsel %vm131_vm1, %v146_v26, 2147483647  ;;  %v149_v29 = vsel %vm131_vm1, %v147_v27, 2147483647 }
 0x102   :  { %vm150_vm4 = vcmp.lt.s32.totalorder %v148_v28, %v149_v29 }
 0x103   :  { %v151_v30 = vsel %vm150_vm4, %v148_v28, %v149_v29 }
 0x104   :  { %v152_v31 = vrot.slane %v151_v30, 4 }
 0x106   :  { %vm153_vm5 = vcmp.lt.s32.totalorder %v151_v30, %v152_v31 }
 0x107   :  { %v154_v32 = vsel %vm153_vm5, %v151_v30, %v152_v31 }
 0x108   :  { %v155_v33 = vrot.slane %v154_v32, 2 }
 0x10a   :  { %vm156_vm6 = vcmp.lt.s32.totalorder %v154_v32, %v155_v33 }
 0x10b   :  { %v157_v34 = vsel %vm156_vm6, %v154_v32, %v155_v33 }
 0x10c   :  { %v158_v35 = vrot.slane %v157_v34, 1 }
 0x10e   :  { %vm159_vm8 = vcmp.lt.s32.totalorder %v157_v34, %v158_v35 }
 0x10f   :  { %v160_v36 = vsel %vm159_vm8, %v157_v34, %v158_v35 }
 0x110   :  { %162 = vst.msk [vmem:[#allocation5] sm:$0x1] %vm161_vm7, %v160_v36 }
 0x111   :  { %226 = shalt.err (!%p223_p12)
}
 0x112   :  { %s227_s8 = scalar_lea.hbm %s307_s3, 16 }
 0x113   :  { %p228_p13 = scmp.ne.s32.totalorder %s307_s3, %s227_s8  ;;  %p231_p0 = scmp.lt.u32.totalorder %s227_s8, %s307_s3 }
 0x115   :  { %p233_p1 = pnand %p231_p0, %p228_p13 }
 0x117   :  { %236 = shalt.err (!%p233_p1)
}
 0x118   :  { %172 = dma.vmem_to_hbm [thread:$0]  %s170_s2, 16, %s307_s3, [#allocation4]  }
 0x119   :  { %239 = dma.done.wait [#allocation4], 16  }
 0x11a   :  { %240 = vsyncadd [#allocation4], 4294967280 }
 0x11b   :  { %176 = vsyncpa [#allocation3], 1 }
 0x11c   :  { %177 = vsyncpa [#allocation4], 1 }

</bundles_post_ra>
